<compile_context>
chip_gen: v6e
topology: v6e:2x2x1
jax: 0.10.0
libtpu: 0.0.40
codegen_flags: <defaults>
</compile_context>

<pallas_src>
import functools
import math

import jax
import jax.numpy as jnp
from jax.experimental import pallas as pl
from jax.experimental.pallas import tpu as pltpu


def _round_up(x, m):
    return ((x + m - 1) // m) * m


def _time_aware_attn_kernel(tcol_ref, trow_ref, q_ref, h_ref,
                            w1_ref, b1_ref, w2_ref, b2_ref,
                            o_ref, m_sc, l_sc, acc_sc, qs_sc,
                            *, hidden, scale, n_valid, tk, mask_kv):
    ki = pl.program_id(1)
    nk = pl.num_programs(1)

    @pl.when(ki == 0)
    def _():
        m_sc[...] = jnp.full_like(m_sc, -jnp.inf)
        l_sc[...] = jnp.zeros_like(l_sc)
        acc_sc[...] = jnp.zeros_like(acc_sc)
        # Fold 1/sqrt(D) into Q once per q tile; reuse across all kv steps.
        qs_sc[...] = (q_ref[...].astype(jnp.float32) * scale).astype(jnp.bfloat16)

    # K/V tile, loaded once, reused for both MXU passes.
    hv = h_ref[...]                                                   # (TK, D) bf16

    # time_weight_net elementwise on |t_i - t_j| :
    #   Linear(1,H) -> ReLU -> Linear(H,1) -> Sigmoid
    diffs = jnp.abs(tcol_ref[...] - trow_ref[...])                    # (TQ, TK) f32
    tw_pre = b2_ref[0] + w2_ref[0] * jnp.maximum(w1_ref[0] * diffs + b1_ref[0], 0.0)
    for hh in range(1, hidden):
        tw_pre = tw_pre + w2_ref[hh] * jnp.maximum(
            w1_ref[hh] * diffs + b1_ref[hh], 0.0)
    time_weights = jax.nn.sigmoid(tw_pre)                             # (TQ, TK) f32

    # scores = (Q / sqrt(D)) @ H^T * time_weights  (bf16 MXU, f32 accumulate)
    s = jax.lax.dot_general(qs_sc[...], hv,
                            dimension_numbers=(((1,), (1,)), ((), ())),
                            preferred_element_type=jnp.float32)       # (TQ, TK)
    s = s * time_weights

    if mask_kv:   # static: only emitted when the kv axis is actually padded
        col = ki * tk + jax.lax.broadcasted_iota(jnp.int32, s.shape, 1)
        s = jnp.where(col < n_valid, s, -jnp.inf)

    # online softmax over the kv axis
    m_prev = m_sc[...]
    m_new = jnp.maximum(m_prev, jnp.max(s, axis=1, keepdims=True))
    alpha = jnp.exp(m_prev - m_new)
    p = jnp.exp(s - m_new)
    l_sc[...] = alpha * l_sc[...] + jnp.sum(p, axis=1, keepdims=True)
    acc_sc[...] = alpha * acc_sc[...] + jnp.dot(
        p.astype(jnp.bfloat16), hv, preferred_element_type=jnp.float32)
    m_sc[...] = m_new

    @pl.when(ki == nk - 1)
    def _():
        o_ref[...] = (acc_sc[...] *
                      pl.reciprocal(l_sc[...], approx=True)).astype(o_ref.dtype)


def time_aware_attention(query_code_embeds, hist_embeddings, hist_times,
                         w1, b1, w2, b2, *, tq_max=256, tk_max=512):
    n, d = query_code_embeds.shape
    hidden = w1.shape[0]

    # Padded, lane-dense layout: D -> multiple of 128, kv tiles multiples of 128.
    d_pad = _round_up(max(d, 128), 128)
    tq = min(tq_max, _round_up(n, 8))
    tk = min(tk_max, _round_up(n, 128))
    nq_pad = _round_up(n, tq)
    nk_pad = _round_up(n, tk)

    # Keep embeddings bf16 end-to-end (MXU-native on v5e/v6e/v7x).
    q = jnp.pad(query_code_embeds.astype(jnp.bfloat16),
                ((0, nq_pad - n), (0, d_pad - d)))
    h = jnp.pad(hist_embeddings.astype(jnp.bfloat16),
                ((0, nk_pad - n), (0, d_pad - d)))
    t = hist_times.astype(jnp.float32)
    tcol = jnp.pad(t, (0, nq_pad - n)).reshape(nq_pad, 1)   # (NQ, 1)
    trow = jnp.pad(t, (0, nk_pad - n)).reshape(1, nk_pad)   # (1, NK)

    grid = (nq_pad // tq, nk_pad // tk)
    kernel = functools.partial(
        _time_aware_attn_kernel,
        hidden=hidden, scale=1.0 / math.sqrt(d),
        n_valid=n, tk=tk, mask_kv=(n < nk_pad))

    smem = pl.BlockSpec(memory_space=pltpu.MemorySpace.SMEM)

    out = pl.pallas_call(
        kernel,
        out_shape=jax.ShapeDtypeStruct((nq_pad, d_pad), jnp.float32),
        grid_spec=pltpu.PrefetchScalarGridSpec(
            num_scalar_prefetch=0,
            grid=grid,
            in_specs=[
                pl.BlockSpec((tq, 1), lambda qi, ki: (qi, 0)),      # times (col)
                pl.BlockSpec((1, tk), lambda qi, ki: (0, ki)),      # times (row)
                pl.BlockSpec((tq, d_pad), lambda qi, ki: (qi, 0)),  # Q tile
                pl.BlockSpec((tk, d_pad), lambda qi, ki: (ki, 0)),  # H (K/V) tile
                smem, smem, smem, smem,                             # MLP params
            ],
            out_specs=pl.BlockSpec((tq, d_pad), lambda qi, ki: (qi, 0)),
            scratch_shapes=[
                pltpu.VMEM((tq, 1), jnp.float32),       # running max m
                pltpu.VMEM((tq, 1), jnp.float32),       # running denom l
                pltpu.VMEM((tq, d_pad), jnp.float32),   # output accumulator
                pltpu.VMEM((tq, d_pad), jnp.bfloat16),  # pre-scaled Q tile
            ],
        ),
        compiler_params=pltpu.CompilerParams(
            dimension_semantics=("parallel", "arbitrary"),
            vmem_limit_bytes=48 * 1024 * 1024,
        ),
    )(tcol, trow, q, h,
      w1.astype(jnp.float32), b1.astype(jnp.float32),
      w2.astype(jnp.float32), b2.astype(jnp.float32))

    return out[:n, :d]


def _reference(query, hist, times, w1, b1, w2, b2):
    q = query.astype(jnp.float32)
    h = hist.astype(jnp.float32)
    d = q.shape[1]
    diffs = jnp.abs(times[:, None] - times[None, :])[..., None]           # (N,N,1)
    hact = jnp.maximum(diffs * w1[None, None, :] + b1[None, None, :], 0.0)
    tw = jax.nn.sigmoid(jnp.sum(hact * w2[None, None, :], axis=-1) + b2[0])
    scores = (q @ h.T) / math.sqrt(d) * tw
    attn = jax.nn.softmax(scores, axis=1)
    return attn @ h


if __name__ == "__main__":
    n_history = 8
    embed_dim = 32
    time_hidden = 16

    key = jax.random.PRNGKey(0)
    k_q, k_h, k_t, k_w1, k_b1, k_w2, k_b2 = jax.random.split(key, 7)

    # Embeddings in their native bf16 dtype (no wrapper upcast).
    query = jax.random.normal(k_q, (n_history, embed_dim),
                              dtype=jnp.float32).astype(jnp.bfloat16)
    hist = jax.random.normal(k_h, (n_history, embed_dim),
                             dtype=jnp.float32).astype(jnp.bfloat16)
    times = jax.random.uniform(k_t, (n_history,), dtype=jnp.float32) * 10.0

    # Deterministic time_weight_net params (Linear(1,H)->ReLU->Linear(H,1)->Sigmoid)
    w1 = jax.random.normal(k_w1, (time_hidden,), dtype=jnp.float32) * 0.5
    b1 = jax.random.normal(k_b1, (time_hidden,), dtype=jnp.float32) * 0.1
    w2 = jax.random.normal(k_w2, (time_hidden,), dtype=jnp.float32) * 0.5
    b2 = jax.random.normal(k_b2, (1,), dtype=jnp.float32) * 0.1

    out = time_aware_attention(query, hist, times, w1, b1, w2, b2)
    out = jax.block_until_ready(out)

    ref = _reference(query, hist, times, w1, b1, w2, b2)
    assert out.shape == (n_history, embed_dim)
    assert jnp.allclose(out, ref, atol=3e-2, rtol=3e-2), "mismatch vs JAX reference"

    print("KERNEL_OK")
</pallas_src>

<mosaic_0001>
module attributes {stable_mosaic.version = 11 : i64} {
  func.func @_time_aware_attn_kernel(%arg0: i32, %arg1: i32, %arg2: memref<8x1xf32, #tpu.memory_space<vmem>>, %arg3: memref<1x128xf32, #tpu.memory_space<vmem>>, %arg4: memref<8x128xbf16, #tpu.memory_space<vmem>>, %arg5: memref<128x128xbf16, #tpu.memory_space<vmem>>, %arg6: memref<16xf32, #tpu.memory_space<smem>>, %arg7: memref<16xf32, #tpu.memory_space<smem>>, %arg8: memref<16xf32, #tpu.memory_space<smem>>, %arg9: memref<1xf32, #tpu.memory_space<smem>>, %arg10: memref<8x128xf32, #tpu.memory_space<vmem>>, %arg11: memref<8x1xf32, #tpu.memory_space<vmem>>, %arg12: memref<8x1xf32, #tpu.memory_space<vmem>>, %arg13: memref<8x128xf32, #tpu.memory_space<vmem>>, %arg14: memref<8x128xbf16, #tpu.memory_space<vmem>>) attributes {dimension_semantics = [#tpu.dimension_semantics<parallel>, #tpu.dimension_semantics<arbitrary>], iteration_bounds = array<i64: 1, 1>, scalar_prefetch = 0 : i64, scratch_operands = 4 : i64, tpu.core_type = #tpu.core_type<tc>, window_params = [{transform_indices = @transform_0, window_bounds = array<i64: 8, 1>}, {transform_indices = @transform_1, window_bounds = array<i64: 1, 128>}, {transform_indices = @transform_2, window_bounds = array<i64: 8, 128>}, {transform_indices = @transform_3, window_bounds = array<i64: 128, 128>}, {transform_indices = @transform_4, window_bounds = array<i64: 16>}, {transform_indices = @transform_5, window_bounds = array<i64: 16>}, {transform_indices = @transform_6, window_bounds = array<i64: 16>}, {transform_indices = @transform_7, window_bounds = array<i64: 1>}, {transform_indices = @transform_8, window_bounds = array<i64: 8, 128>}]} {
    %c0_i32 = arith.constant 0 : i32
    %0 = arith.cmpi eq, %arg1, %c0_i32 : i32
    %1 = arith.extui %0 : i1 to i32
    %c0_i32_0 = arith.constant 0 : i32
    %2 = arith.cmpi ne, %1, %c0_i32_0 : i32
    scf.if %2 {
      %cst_77 = arith.constant 0xFF800000 : f32
      %246 = vector.broadcast %cst_77 : f32 to vector<8x1xf32>
      %c0_78 = arith.constant 0 : index
      %c0_79 = arith.constant 0 : index
      %247 = vector.load %arg11[%c0_78, %c0_79] : memref<8x1xf32, #tpu.memory_space<vmem>>, vector<8x1xf32>
      tpu.vector_store %arg11[%c0_78, %c0_79], %246 {strides = array<i32>} : memref<8x1xf32, #tpu.memory_space<vmem>>, vector<8x1xf32>,
      %cst_80 = arith.constant 0.000000e+00 : f32
      %248 = vector.broadcast %cst_80 : f32 to vector<8x1xf32>
      %c0_81 = arith.constant 0 : index
      %c0_82 = arith.constant 0 : index
      %249 = vector.load %arg12[%c0_81, %c0_82] : memref<8x1xf32, #tpu.memory_space<vmem>>, vector<8x1xf32>
      tpu.vector_store %arg12[%c0_81, %c0_82], %248 {strides = array<i32>} : memref<8x1xf32, #tpu.memory_space<vmem>>, vector<8x1xf32>,
      %cst_83 = arith.constant 0.000000e+00 : f32
      %250 = vector.broadcast %cst_83 : f32 to vector<8x128xf32>
      %c0_84 = arith.constant 0 : index
      %c0_85 = arith.constant 0 : index
      %251 = vector.load %arg13[%c0_84, %c0_85] : memref<8x128xf32, #tpu.memory_space<vmem>>, vector<8x128xf32>
      tpu.vector_store %arg13[%c0_84, %c0_85], %250 {strides = array<i32>} : memref<8x128xf32, #tpu.memory_space<vmem>>, vector<8x128xf32>,
      %c0_86 = arith.constant 0 : index
      %c0_87 = arith.constant 0 : index
      %252 = vector.load %arg4[%c0_86, %c0_87] : memref<8x128xbf16, #tpu.memory_space<vmem>>, vector<8x128xbf16>
      %253 = arith.extf %252 : vector<8x128xbf16> to vector<8x128xf32>
      %cst_88 = arith.constant 0.176776692 : f32
      %254 = vector.broadcast %cst_88 : f32 to vector<8x128xf32>
      %255 = arith.mulf %253, %254 : vector<8x128xf32>
      %256 = arith.truncf %255 : vector<8x128xf32> to vector<8x128xbf16>
      %c0_89 = arith.constant 0 : index
      %c0_90 = arith.constant 0 : index
      %257 = vector.load %arg14[%c0_89, %c0_90] : memref<8x128xbf16, #tpu.memory_space<vmem>>, vector<8x128xbf16>
      tpu.vector_store %arg14[%c0_89, %c0_90], %256 {strides = array<i32>} : memref<8x128xbf16, #tpu.memory_space<vmem>>, vector<8x128xbf16>,
    } else {
    }
    %c0 = arith.constant 0 : index
    %c0_1 = arith.constant 0 : index
    %3 = vector.load %arg5[%c0, %c0_1] : memref<128x128xbf16, #tpu.memory_space<vmem>>, vector<128x128xbf16>
    %c0_2 = arith.constant 0 : index
    %c0_3 = arith.constant 0 : index
    %4 = vector.load %arg2[%c0_2, %c0_3] : memref<8x1xf32, #tpu.memory_space<vmem>>, vector<8x1xf32>
    %c0_4 = arith.constant 0 : index
    %c0_5 = arith.constant 0 : index
    %5 = vector.load %arg3[%c0_4, %c0_5] : memref<1x128xf32, #tpu.memory_space<vmem>>, vector<1x128xf32>
    %6 = vector.broadcast %4 : vector<8x1xf32> to vector<8x128xf32>
    %7 = vector.broadcast %5 : vector<1x128xf32> to vector<8x128xf32>
    %8 = arith.subf %6, %7 : vector<8x128xf32>
    %9 = math.absf %8 : vector<8x128xf32>
    %c0_6 = arith.constant 0 : index
    %10 = memref.load %arg9[%c0_6] : memref<1xf32, #tpu.memory_space<smem>>
    %c0_7 = arith.constant 0 : index
    %11 = memref.load %arg8[%c0_7] : memref<16xf32, #tpu.memory_space<smem>>
    %c0_8 = arith.constant 0 : index
    %12 = memref.load %arg6[%c0_8] : memref<16xf32, #tpu.memory_space<smem>>
    %13 = vector.broadcast %12 : f32 to vector<8x128xf32>
    %14 = arith.mulf %13, %9 : vector<8x128xf32>
    %c0_9 = arith.constant 0 : index
    %15 = memref.load %arg7[%c0_9] : memref<16xf32, #tpu.memory_space<smem>>
    %16 = vector.broadcast %15 : f32 to vector<8x128xf32>
    %17 = arith.addf %14, %16 : vector<8x128xf32>
    %cst = arith.constant 0.000000e+00 : f32
    %18 = vector.broadcast %cst : f32 to vector<8x128xf32>
    %19 = arith.maximumf %17, %18 : vector<8x128xf32>
    %20 = vector.broadcast %11 : f32 to vector<8x128xf32>
    %21 = arith.mulf %20, %19 : vector<8x128xf32>
    %22 = vector.broadcast %10 : f32 to vector<8x128xf32>
    %23 = arith.addf %22, %21 : vector<8x128xf32>
    %c1 = arith.constant 1 : index
    %24 = memref.load %arg8[%c1] : memref<16xf32, #tpu.memory_space<smem>>
    %c1_10 = arith.constant 1 : index
    %25 = memref.load %arg6[%c1_10] : memref<16xf32, #tpu.memory_space<smem>>
    %26 = vector.broadcast %25 : f32 to vector<8x128xf32>
    %27 = arith.mulf %26, %9 : vector<8x128xf32>
    %c1_11 = arith.constant 1 : index
    %28 = memref.load %arg7[%c1_11] : memref<16xf32, #tpu.memory_space<smem>>
    %29 = vector.broadcast %28 : f32 to vector<8x128xf32>
    %30 = arith.addf %27, %29 : vector<8x128xf32>
    %cst_12 = arith.constant 0.000000e+00 : f32
    %31 = vector.broadcast %cst_12 : f32 to vector<8x128xf32>
    %32 = arith.maximumf %30, %31 : vector<8x128xf32>
    %33 = vector.broadcast %24 : f32 to vector<8x128xf32>
    %34 = arith.mulf %33, %32 : vector<8x128xf32>
    %35 = arith.addf %23, %34 : vector<8x128xf32>
    %c2 = arith.constant 2 : index
    %36 = memref.load %arg8[%c2] : memref<16xf32, #tpu.memory_space<smem>>
    %c2_13 = arith.constant 2 : index
    %37 = memref.load %arg6[%c2_13] : memref<16xf32, #tpu.memory_space<smem>>
    %38 = vector.broadcast %37 : f32 to vector<8x128xf32>
    %39 = arith.mulf %38, %9 : vector<8x128xf32>
    %c2_14 = arith.constant 2 : index
    %40 = memref.load %arg7[%c2_14] : memref<16xf32, #tpu.memory_space<smem>>
    %41 = vector.broadcast %40 : f32 to vector<8x128xf32>
    %42 = arith.addf %39, %41 : vector<8x128xf32>
    %cst_15 = arith.constant 0.000000e+00 : f32
    %43 = vector.broadcast %cst_15 : f32 to vector<8x128xf32>
    %44 = arith.maximumf %42, %43 : vector<8x128xf32>
    %45 = vector.broadcast %36 : f32 to vector<8x128xf32>
    %46 = arith.mulf %45, %44 : vector<8x128xf32>
    %47 = arith.addf %35, %46 : vector<8x128xf32>
    %c3 = arith.constant 3 : index
    %48 = memref.load %arg8[%c3] : memref<16xf32, #tpu.memory_space<smem>>
    %c3_16 = arith.constant 3 : index
    %49 = memref.load %arg6[%c3_16] : memref<16xf32, #tpu.memory_space<smem>>
    %50 = vector.broadcast %49 : f32 to vector<8x128xf32>
    %51 = arith.mulf %50, %9 : vector<8x128xf32>
    %c3_17 = arith.constant 3 : index
    %52 = memref.load %arg7[%c3_17] : memref<16xf32, #tpu.memory_space<smem>>
    %53 = vector.broadcast %52 : f32 to vector<8x128xf32>
    %54 = arith.addf %51, %53 : vector<8x128xf32>
    %cst_18 = arith.constant 0.000000e+00 : f32
    %55 = vector.broadcast %cst_18 : f32 to vector<8x128xf32>
    %56 = arith.maximumf %54, %55 : vector<8x128xf32>
    %57 = vector.broadcast %48 : f32 to vector<8x128xf32>
    %58 = arith.mulf %57, %56 : vector<8x128xf32>
    %59 = arith.addf %47, %58 : vector<8x128xf32>
    %c4 = arith.constant 4 : index
    %60 = memref.load %arg8[%c4] : memref<16xf32, #tpu.memory_space<smem>>
    %c4_19 = arith.constant 4 : index
    %61 = memref.load %arg6[%c4_19] : memref<16xf32, #tpu.memory_space<smem>>
    %62 = vector.broadcast %61 : f32 to vector<8x128xf32>
    %63 = arith.mulf %62, %9 : vector<8x128xf32>
    %c4_20 = arith.constant 4 : index
    %64 = memref.load %arg7[%c4_20] : memref<16xf32, #tpu.memory_space<smem>>
    %65 = vector.broadcast %64 : f32 to vector<8x128xf32>
    %66 = arith.addf %63, %65 : vector<8x128xf32>
    %cst_21 = arith.constant 0.000000e+00 : f32
    %67 = vector.broadcast %cst_21 : f32 to vector<8x128xf32>
    %68 = arith.maximumf %66, %67 : vector<8x128xf32>
    %69 = vector.broadcast %60 : f32 to vector<8x128xf32>
    %70 = arith.mulf %69, %68 : vector<8x128xf32>
    %71 = arith.addf %59, %70 : vector<8x128xf32>
    %c5 = arith.constant 5 : index
    %72 = memref.load %arg8[%c5] : memref<16xf32, #tpu.memory_space<smem>>
    %c5_22 = arith.constant 5 : index
    %73 = memref.load %arg6[%c5_22] : memref<16xf32, #tpu.memory_space<smem>>
    %74 = vector.broadcast %73 : f32 to vector<8x128xf32>
    %75 = arith.mulf %74, %9 : vector<8x128xf32>
    %c5_23 = arith.constant 5 : index
    %76 = memref.load %arg7[%c5_23] : memref<16xf32, #tpu.memory_space<smem>>
    %77 = vector.broadcast %76 : f32 to vector<8x128xf32>
    %78 = arith.addf %75, %77 : vector<8x128xf32>
    %cst_24 = arith.constant 0.000000e+00 : f32
    %79 = vector.broadcast %cst_24 : f32 to vector<8x128xf32>
    %80 = arith.maximumf %78, %79 : vector<8x128xf32>
    %81 = vector.broadcast %72 : f32 to vector<8x128xf32>
    %82 = arith.mulf %81, %80 : vector<8x128xf32>
    %83 = arith.addf %71, %82 : vector<8x128xf32>
    %c6 = arith.constant 6 : index
    %84 = memref.load %arg8[%c6] : memref<16xf32, #tpu.memory_space<smem>>
    %c6_25 = arith.constant 6 : index
    %85 = memref.load %arg6[%c6_25] : memref<16xf32, #tpu.memory_space<smem>>
    %86 = vector.broadcast %85 : f32 to vector<8x128xf32>
    %87 = arith.mulf %86, %9 : vector<8x128xf32>
    %c6_26 = arith.constant 6 : index
    %88 = memref.load %arg7[%c6_26] : memref<16xf32, #tpu.memory_space<smem>>
    %89 = vector.broadcast %88 : f32 to vector<8x128xf32>
    %90 = arith.addf %87, %89 : vector<8x128xf32>
    %cst_27 = arith.constant 0.000000e+00 : f32
    %91 = vector.broadcast %cst_27 : f32 to vector<8x128xf32>
    %92 = arith.maximumf %90, %91 : vector<8x128xf32>
    %93 = vector.broadcast %84 : f32 to vector<8x128xf32>
    %94 = arith.mulf %93, %92 : vector<8x128xf32>
    %95 = arith.addf %83, %94 : vector<8x128xf32>
    %c7 = arith.constant 7 : index
    %96 = memref.load %arg8[%c7] : memref<16xf32, #tpu.memory_space<smem>>
    %c7_28 = arith.constant 7 : index
    %97 = memref.load %arg6[%c7_28] : memref<16xf32, #tpu.memory_space<smem>>
    %98 = vector.broadcast %97 : f32 to vector<8x128xf32>
    %99 = arith.mulf %98, %9 : vector<8x128xf32>
    %c7_29 = arith.constant 7 : index
    %100 = memref.load %arg7[%c7_29] : memref<16xf32, #tpu.memory_space<smem>>
    %101 = vector.broadcast %100 : f32 to vector<8x128xf32>
    %102 = arith.addf %99, %101 : vector<8x128xf32>
    %cst_30 = arith.constant 0.000000e+00 : f32
    %103 = vector.broadcast %cst_30 : f32 to vector<8x128xf32>
    %104 = arith.maximumf %102, %103 : vector<8x128xf32>
    %105 = vector.broadcast %96 : f32 to vector<8x128xf32>
    %106 = arith.mulf %105, %104 : vector<8x128xf32>
    %107 = arith.addf %95, %106 : vector<8x128xf32>
    %c8 = arith.constant 8 : index
    %108 = memref.load %arg8[%c8] : memref<16xf32, #tpu.memory_space<smem>>
    %c8_31 = arith.constant 8 : index
    %109 = memref.load %arg6[%c8_31] : memref<16xf32, #tpu.memory_space<smem>>
    %110 = vector.broadcast %109 : f32 to vector<8x128xf32>
    %111 = arith.mulf %110, %9 : vector<8x128xf32>
    %c8_32 = arith.constant 8 : index
    %112 = memref.load %arg7[%c8_32] : memref<16xf32, #tpu.memory_space<smem>>
    %113 = vector.broadcast %112 : f32 to vector<8x128xf32>
    %114 = arith.addf %111, %113 : vector<8x128xf32>
    %cst_33 = arith.constant 0.000000e+00 : f32
    %115 = vector.broadcast %cst_33 : f32 to vector<8x128xf32>
    %116 = arith.maximumf %114, %115 : vector<8x128xf32>
    %117 = vector.broadcast %108 : f32 to vector<8x128xf32>
    %118 = arith.mulf %117, %116 : vector<8x128xf32>
    %119 = arith.addf %107, %118 : vector<8x128xf32>
    %c9 = arith.constant 9 : index
    %120 = memref.load %arg8[%c9] : memref<16xf32, #tpu.memory_space<smem>>
    %c9_34 = arith.constant 9 : index
    %121 = memref.load %arg6[%c9_34] : memref<16xf32, #tpu.memory_space<smem>>
    %122 = vector.broadcast %121 : f32 to vector<8x128xf32>
    %123 = arith.mulf %122, %9 : vector<8x128xf32>
    %c9_35 = arith.constant 9 : index
    %124 = memref.load %arg7[%c9_35] : memref<16xf32, #tpu.memory_space<smem>>
    %125 = vector.broadcast %124 : f32 to vector<8x128xf32>
    %126 = arith.addf %123, %125 : vector<8x128xf32>
    %cst_36 = arith.constant 0.000000e+00 : f32
    %127 = vector.broadcast %cst_36 : f32 to vector<8x128xf32>
    %128 = arith.maximumf %126, %127 : vector<8x128xf32>
    %129 = vector.broadcast %120 : f32 to vector<8x128xf32>
    %130 = arith.mulf %129, %128 : vector<8x128xf32>
    %131 = arith.addf %119, %130 : vector<8x128xf32>
    %c10 = arith.constant 10 : index
    %132 = memref.load %arg8[%c10] : memref<16xf32, #tpu.memory_space<smem>>
    %c10_37 = arith.constant 10 : index
    %133 = memref.load %arg6[%c10_37] : memref<16xf32, #tpu.memory_space<smem>>
    %134 = vector.broadcast %133 : f32 to vector<8x128xf32>
    %135 = arith.mulf %134, %9 : vector<8x128xf32>
    %c10_38 = arith.constant 10 : index
    %136 = memref.load %arg7[%c10_38] : memref<16xf32, #tpu.memory_space<smem>>
    %137 = vector.broadcast %136 : f32 to vector<8x128xf32>
    %138 = arith.addf %135, %137 : vector<8x128xf32>
    %cst_39 = arith.constant 0.000000e+00 : f32
    %139 = vector.broadcast %cst_39 : f32 to vector<8x128xf32>
    %140 = arith.maximumf %138, %139 : vector<8x128xf32>
    %141 = vector.broadcast %132 : f32 to vector<8x128xf32>
    %142 = arith.mulf %141, %140 : vector<8x128xf32>
    %143 = arith.addf %131, %142 : vector<8x128xf32>
    %c11 = arith.constant 11 : index
    %144 = memref.load %arg8[%c11] : memref<16xf32, #tpu.memory_space<smem>>
    %c11_40 = arith.constant 11 : index
    %145 = memref.load %arg6[%c11_40] : memref<16xf32, #tpu.memory_space<smem>>
    %146 = vector.broadcast %145 : f32 to vector<8x128xf32>
    %147 = arith.mulf %146, %9 : vector<8x128xf32>
    %c11_41 = arith.constant 11 : index
    %148 = memref.load %arg7[%c11_41] : memref<16xf32, #tpu.memory_space<smem>>
    %149 = vector.broadcast %148 : f32 to vector<8x128xf32>
    %150 = arith.addf %147, %149 : vector<8x128xf32>
    %cst_42 = arith.constant 0.000000e+00 : f32
    %151 = vector.broadcast %cst_42 : f32 to vector<8x128xf32>
    %152 = arith.maximumf %150, %151 : vector<8x128xf32>
    %153 = vector.broadcast %144 : f32 to vector<8x128xf32>
    %154 = arith.mulf %153, %152 : vector<8x128xf32>
    %155 = arith.addf %143, %154 : vector<8x128xf32>
    %c12 = arith.constant 12 : index
    %156 = memref.load %arg8[%c12] : memref<16xf32, #tpu.memory_space<smem>>
    %c12_43 = arith.constant 12 : index
    %157 = memref.load %arg6[%c12_43] : memref<16xf32, #tpu.memory_space<smem>>
    %158 = vector.broadcast %157 : f32 to vector<8x128xf32>
    %159 = arith.mulf %158, %9 : vector<8x128xf32>
    %c12_44 = arith.constant 12 : index
    %160 = memref.load %arg7[%c12_44] : memref<16xf32, #tpu.memory_space<smem>>
    %161 = vector.broadcast %160 : f32 to vector<8x128xf32>
    %162 = arith.addf %159, %161 : vector<8x128xf32>
    %cst_45 = arith.constant 0.000000e+00 : f32
    %163 = vector.broadcast %cst_45 : f32 to vector<8x128xf32>
    %164 = arith.maximumf %162, %163 : vector<8x128xf32>
    %165 = vector.broadcast %156 : f32 to vector<8x128xf32>
    %166 = arith.mulf %165, %164 : vector<8x128xf32>
    %167 = arith.addf %155, %166 : vector<8x128xf32>
    %c13 = arith.constant 13 : index
    %168 = memref.load %arg8[%c13] : memref<16xf32, #tpu.memory_space<smem>>
    %c13_46 = arith.constant 13 : index
    %169 = memref.load %arg6[%c13_46] : memref<16xf32, #tpu.memory_space<smem>>
    %170 = vector.broadcast %169 : f32 to vector<8x128xf32>
    %171 = arith.mulf %170, %9 : vector<8x128xf32>
    %c13_47 = arith.constant 13 : index
    %172 = memref.load %arg7[%c13_47] : memref<16xf32, #tpu.memory_space<smem>>
    %173 = vector.broadcast %172 : f32 to vector<8x128xf32>
    %174 = arith.addf %171, %173 : vector<8x128xf32>
    %cst_48 = arith.constant 0.000000e+00 : f32
    %175 = vector.broadcast %cst_48 : f32 to vector<8x128xf32>
    %176 = arith.maximumf %174, %175 : vector<8x128xf32>
    %177 = vector.broadcast %168 : f32 to vector<8x128xf32>
    %178 = arith.mulf %177, %176 : vector<8x128xf32>
    %179 = arith.addf %167, %178 : vector<8x128xf32>
    %c14 = arith.constant 14 : index
    %180 = memref.load %arg8[%c14] : memref<16xf32, #tpu.memory_space<smem>>
    %c14_49 = arith.constant 14 : index
    %181 = memref.load %arg6[%c14_49] : memref<16xf32, #tpu.memory_space<smem>>
    %182 = vector.broadcast %181 : f32 to vector<8x128xf32>
    %183 = arith.mulf %182, %9 : vector<8x128xf32>
    %c14_50 = arith.constant 14 : index
    %184 = memref.load %arg7[%c14_50] : memref<16xf32, #tpu.memory_space<smem>>
    %185 = vector.broadcast %184 : f32 to vector<8x128xf32>
    %186 = arith.addf %183, %185 : vector<8x128xf32>
    %cst_51 = arith.constant 0.000000e+00 : f32
    %187 = vector.broadcast %cst_51 : f32 to vector<8x128xf32>
    %188 = arith.maximumf %186, %187 : vector<8x128xf32>
    %189 = vector.broadcast %180 : f32 to vector<8x128xf32>
    %190 = arith.mulf %189, %188 : vector<8x128xf32>
    %191 = arith.addf %179, %190 : vector<8x128xf32>
    %c15 = arith.constant 15 : index
    %192 = memref.load %arg8[%c15] : memref<16xf32, #tpu.memory_space<smem>>
    %c15_52 = arith.constant 15 : index
    %193 = memref.load %arg6[%c15_52] : memref<16xf32, #tpu.memory_space<smem>>
    %194 = vector.broadcast %193 : f32 to vector<8x128xf32>
    %195 = arith.mulf %194, %9 : vector<8x128xf32>
    %c15_53 = arith.constant 15 : index
    %196 = memref.load %arg7[%c15_53] : memref<16xf32, #tpu.memory_space<smem>>
    %197 = vector.broadcast %196 : f32 to vector<8x128xf32>
    %198 = arith.addf %195, %197 : vector<8x128xf32>
    %cst_54 = arith.constant 0.000000e+00 : f32
    %199 = vector.broadcast %cst_54 : f32 to vector<8x128xf32>
    %200 = arith.maximumf %198, %199 : vector<8x128xf32>
    %201 = vector.broadcast %192 : f32 to vector<8x128xf32>
    %202 = arith.mulf %201, %200 : vector<8x128xf32>
    %203 = arith.addf %191, %202 : vector<8x128xf32>
    %204 = arith.negf %203 : vector<8x128xf32>
    %205 = math.exp %204 : vector<8x128xf32>
    %cst_55 = arith.constant 1.000000e+00 : f32
    %206 = vector.broadcast %cst_55 : f32 to vector<8x128xf32>
    %207 = arith.addf %206, %205 : vector<8x128xf32>
    %208 = arith.divf %206, %207 : vector<8x128xf32>
    %c0_56 = arith.constant 0 : index
    %c0_57 = arith.constant 0 : index
    %209 = vector.load %arg14[%c0_56, %c0_57] : memref<8x128xbf16, #tpu.memory_space<vmem>>, vector<8x128xbf16>
    %cst_58 = arith.constant dense<0.000000e+00> : vector<8x128xf32>
    %210 = tpu.matmul %209, %3, %cst_58 {dimension_numbers = #tpu.dot_dimension_numbers<[1], [1], [0], [0], [0, 0, 1, 0], [], []>} : vector<8x128xbf16>, vector<128x128xbf16>, vector<8x128xf32> -> vector<8x128xf32>
    %211 = arith.mulf %210, %208 : vector<8x128xf32>
    %c128_i32 = arith.constant 128 : i32
    %212 = arith.muli %arg1, %c128_i32 : i32
    %213 = tpu.iota {dimensions = array<i32: 1>} : vector<8x128xi32>
    %214 = vector.broadcast %212 : i32 to vector<8x128xi32>
    %215 = arith.addi %214, %213 : vector<8x128xi32>
    %c8_i32 = arith.constant 8 : i32
    %216 = vector.broadcast %c8_i32 : i32 to vector<8x128xi32>
    %217 = arith.cmpi slt, %215, %216 : vector<8x128xi32>
    %cst_59 = arith.constant 0xFF800000 : f32
    %218 = vector.broadcast %cst_59 : f32 to vector<8x128xf32>
    %219 = arith.select %217, %211, %218 : vector<8x128xi1>, vector<8x128xf32>
    %c0_60 = arith.constant 0 : index
    %c0_61 = arith.constant 0 : index
    %220 = vector.load %arg11[%c0_60, %c0_61] : memref<8x1xf32, #tpu.memory_space<vmem>>, vector<8x1xf32>
    %cst_62 = arith.constant dense<0xFF800000> : vector<8xf32>
    %221 = vector.multi_reduction <maximumf>, %219, %cst_62 [1] : vector<8x128xf32> to vector<8xf32>
    %222 = vector.shape_cast %221 : vector<8xf32> to vector<8x1xf32>
    %223 = arith.maximumf %220, %222 : vector<8x1xf32>
    %224 = arith.subf %220, %223 : vector<8x1xf32>
    %225 = math.exp %224 : vector<8x1xf32>
    %226 = vector.broadcast %223 : vector<8x1xf32> to vector<8x128xf32>
    %227 = arith.subf %219, %226 : vector<8x128xf32>
    %228 = math.exp %227 : vector<8x128xf32>
    %c0_63 = arith.constant 0 : index
    %c0_64 = arith.constant 0 : index
    %229 = vector.load %arg12[%c0_63, %c0_64] : memref<8x1xf32, #tpu.memory_space<vmem>>, vector<8x1xf32>
    %230 = arith.mulf %225, %229 : vector<8x1xf32>
    %cst_65 = arith.constant dense<0.000000e+00> : vector<8xf32>
    %231 = vector.multi_reduction <add>, %228, %cst_65 [1] : vector<8x128xf32> to vector<8xf32>
    %232 = vector.shape_cast %231 : vector<8xf32> to vector<8x1xf32>
    %233 = arith.addf %230, %232 : vector<8x1xf32>
    %c0_66 = arith.constant 0 : index
    %c0_67 = arith.constant 0 : index
    %234 = vector.load %arg12[%c0_66, %c0_67] : memref<8x1xf32, #tpu.memory_space<vmem>>, vector<8x1xf32>
    tpu.vector_store %arg12[%c0_66, %c0_67], %233 {strides = array<i32>} : memref<8x1xf32, #tpu.memory_space<vmem>>, vector<8x1xf32>,
    %c0_68 = arith.constant 0 : index
    %c0_69 = arith.constant 0 : index
    %235 = vector.load %arg13[%c0_68, %c0_69] : memref<8x128xf32, #tpu.memory_space<vmem>>, vector<8x128xf32>
    %236 = vector.broadcast %225 : vector<8x1xf32> to vector<8x128xf32>
    %237 = arith.mulf %236, %235 : vector<8x128xf32>
    %238 = arith.truncf %228 : vector<8x128xf32> to vector<8x128xbf16>
    %cst_70 = arith.constant dense<0.000000e+00> : vector<8x128xf32>
    %239 = tpu.matmul %238, %3, %cst_70 {dimension_numbers = #tpu.dot_dimension_numbers<[1], [0], [0], [1], [0, 0, 1, 1], [], []>} : vector<8x128xbf16>, vector<128x128xbf16>, vector<8x128xf32> -> vector<8x128xf32>
    %240 = arith.addf %237, %239 : vector<8x128xf32>
    %c0_71 = arith.constant 0 : index
    %c0_72 = arith.constant 0 : index
    %241 = vector.load %arg13[%c0_71, %c0_72] : memref<8x128xf32, #tpu.memory_space<vmem>>, vector<8x128xf32>
    tpu.vector_store %arg13[%c0_71, %c0_72], %240 {strides = array<i32>} : memref<8x128xf32, #tpu.memory_space<vmem>>, vector<8x128xf32>,
    %c0_73 = arith.constant 0 : index
    %c0_74 = arith.constant 0 : index
    %242 = vector.load %arg11[%c0_73, %c0_74] : memref<8x1xf32, #tpu.memory_space<vmem>>, vector<8x1xf32>
    tpu.vector_store %arg11[%c0_73, %c0_74], %223 {strides = array<i32>} : memref<8x1xf32, #tpu.memory_space<vmem>>, vector<8x1xf32>,
    %c0_i32_75 = arith.constant 0 : i32
    %243 = arith.cmpi eq, %arg1, %c0_i32_75 : i32
    %244 = arith.extui %243 : i1 to i32
    %c0_i32_76 = arith.constant 0 : i32
    %245 = arith.cmpi ne, %244, %c0_i32_76 : i32
    scf.if %245 {
      %c0_77 = arith.constant 0 : index
      %c0_78 = arith.constant 0 : index
      %246 = vector.load %arg13[%c0_77, %c0_78] : memref<8x128xf32, #tpu.memory_space<vmem>>, vector<8x128xf32>
      %c0_79 = arith.constant 0 : index
      %c0_80 = arith.constant 0 : index
      %247 = vector.load %arg12[%c0_79, %c0_80] : memref<8x1xf32, #tpu.memory_space<vmem>>, vector<8x1xf32>
      %248 = tpu.reciprocal %247 {approx = true} : vector<8x1xf32> -> vector<8x1xf32>
      %249 = vector.broadcast %248 : vector<8x1xf32> to vector<8x128xf32>
      %250 = arith.mulf %246, %249 : vector<8x128xf32>
      %c0_81 = arith.constant 0 : index
      %c0_82 = arith.constant 0 : index
      %251 = vector.load %arg10[%c0_81, %c0_82] : memref<8x128xf32, #tpu.memory_space<vmem>>, vector<8x128xf32>
      tpu.vector_store %arg10[%c0_81, %c0_82], %250 {strides = array<i32>} : memref<8x128xf32, #tpu.memory_space<vmem>>, vector<8x128xf32>,
    } else {
    }
    return
  }
  func.func @transform_0(%arg0: i32, %arg1: i32) -> (i32, i32) {
    %c0_i32 = arith.constant 0 : i32
    %c0_i32_0 = arith.constant 0 : i32
    return %arg0, %c0_i32 : i32, i32
  }
  func.func @transform_1(%arg0: i32, %arg1: i32) -> (i32, i32) {
    %c0_i32 = arith.constant 0 : i32
    %c0_i32_0 = arith.constant 0 : i32
    return %c0_i32, %arg1 : i32, i32
  }
  func.func @transform_2(%arg0: i32, %arg1: i32) -> (i32, i32) {
    %c0_i32 = arith.constant 0 : i32
    %c0_i32_0 = arith.constant 0 : i32
    return %arg0, %c0_i32 : i32, i32
  }
  func.func @transform_3(%arg0: i32, %arg1: i32) -> (i32, i32) {
    %c0_i32 = arith.constant 0 : i32
    %c0_i32_0 = arith.constant 0 : i32
    return %arg1, %c0_i32 : i32, i32
  }
  func.func @transform_4(%arg0: i32, %arg1: i32) -> i32 {
    %c0_i32 = arith.constant 0 : i32
    %c0_i32_0 = arith.constant 0 : i32
    return %c0_i32 : i32
  }
  func.func @transform_5(%arg0: i32, %arg1: i32) -> i32 {
    %c0_i32 = arith.constant 0 : i32
    %c0_i32_0 = arith.constant 0 : i32
    return %c0_i32 : i32
  }
  func.func @transform_6(%arg0: i32, %arg1: i32) -> i32 {
    %c0_i32 = arith.constant 0 : i32
    %c0_i32_0 = arith.constant 0 : i32
    return %c0_i32 : i32
  }
  func.func @transform_7(%arg0: i32, %arg1: i32) -> i32 {
    %c0_i32 = arith.constant 0 : i32
    %c0_i32_0 = arith.constant 0 : i32
    return %c0_i32 : i32
  }
  func.func @transform_8(%arg0: i32, %arg1: i32) -> (i32, i32) {
    %c0_i32 = arith.constant 0 : i32
    %c0_i32_0 = arith.constant 0 : i32
    return %arg0, %c0_i32 : i32, i32
  }
}

</mosaic_0001>

<bundles_post_ra>
// kernel: tpu_custom_call.1
= control target key start
LH: loop header
LB: loop body
LE: loop exit
PB: predicated region body
PF: predicated region fallthrough
CT: control target
= control target key end

     0   :  { %14 = vsyncpa [#allocation8], 0  ;;  %s907_s0 = inlined_call_operand.vmem [shape: f32[8,1], index: 0, kind: input, shape index: {}]   ;;  %s908_s1 = inlined_call_operand.vmem [shape: f32[1,128], index: 1, kind: input, shape index: {}]   ;;  %s909_s2 = inlined_call_operand.vmem [shape: bf16[8,128], index: 2, kind: input, shape index: {}]   ;;  %s910_s3 = inlined_call_operand.hbm [shape: bf16[128,128], index: 3, kind: input, shape index: {}]   ;;  %s911_s4 = inlined_call_operand.vmem [shape: f32[16], index: 4, kind: input, shape index: {}]   ;;  %s912_s5 = inlined_call_operand.vmem [shape: f32[16], index: 5, kind: input, shape index: {}]   ;;  %s913_s6 = inlined_call_operand.vmem [shape: f32[16], index: 6, kind: input, shape index: {}]   ;;  %s914_s7 = inlined_call_operand.<no memory space> [shape: f32[1], index: 7, kind: input, shape index: {}]   ;;  %s915_s8 = inlined_call_operand.hbm [shape: f32[8,128], index: 8, kind: output, shape index: {}]  }
   0x1   :  { %15 = vsyncpa [#allocation10], 0 }
   0x2   :  { %16 = vsyncpa [#allocation13], 0  ;;  %s52_s29 = sshll.u32 %s912_s5, 4  ;;  %s53_s29 = int_to_ptr.vmem [resolvable:$true] %s52_s29 }
   0x3   :  { %17 = vsyncpa [#allocation9], 0  ;;  %s654_s30 = scalar_lea.vmem %s53_s29, 16  ;;  %p659_p1 = scmp.lt.s32.totalorder %s53_s29, %s53_s29 }
   0x4   :  { %p655_p0 = scmp.ne.s32.totalorder %s53_s29, %s654_s30  ;;  %p660_p2 = scmp.lt.s32.totalorder %s654_s30, %s654_s30 }
   0x6   :  { %p661_p3 = por %p660_p2, %p659_p1 }
   0x8   :  { %p662_p4 = pnand %p661_p3, %p655_p0 }
   0xa   :  { %665 = shalt.err (!%p662_p4)
}
   0xb   :  { %s738_s9 = smov [#allocation12]   ;;  %s739_s10 = smov [#allocation7]  }
   0xc   :  { %55 = dma.vmem_to_smem %s53_s29, 16, %s738_s9, [#allocation13]  }
   0xd   :  { %s29_s11 = sshll.u32 %s739_s10, 4  ;;  %s30_s11 = int_to_ptr.vmem [resolvable:$true] %s29_s11 }
   0xe   :  { %s674_s12 = scalar_lea.vmem %s30_s11, 1024  ;;  %p679_p6 = scmp.lt.s32.totalorder %s30_s11, %s30_s11 }
   0xf   :  { %p675_p5 = scmp.ne.s32.totalorder %s30_s11, %s674_s12  ;;  %p680_p7 = scmp.lt.s32.totalorder %s674_s12, %s674_s12 }
  0x11   :  { %p681_p8 = por %p680_p7, %p679_p6 }
  0x13   :  { %p682_p9 = pnand %p681_p8, %p675_p5 }
  0x15   :  { %685 = shalt.err (!%p682_p9)
}
  0x16   :  { %s740_s5 = smov 64   ;;  %s741_s13 = smov 4  }
  0x17   :  { %35 = dma.hbm_to_vmem [thread:$0]  %s910_s3, 1024, %s30_s11, [#allocation8], %s740_s5, %s740_s5, %s741_s13  }
  0x18   :  { %s42_s18 = sshll.u32 %s911_s4, 4  ;;  %s62_s21 = sshll.u32 %s913_s6, 4  ;;  %s43_s18 = int_to_ptr.vmem [resolvable:$true] %s42_s18  ;;  %s63_s21 = int_to_ptr.vmem [resolvable:$true] %s62_s21 }
  0x19   :  { %s686_s22 = scalar_lea.vmem %s43_s18, 16  ;;  %p691_p11 = scmp.lt.s32.totalorder %s43_s18, %s43_s18 }
  0x1a   :  { %p687_p10 = scmp.ne.s32.totalorder %s43_s18, %s686_s22  ;;  %p692_p12 = scmp.lt.s32.totalorder %s686_s22, %s686_s22 }
  0x1c   :  { %p693_p13 = por %p692_p12, %p691_p11 }
  0x1e   :  { %p694_p0 = pnand %p693_p13, %p687_p10 }
  0x20   :  { %697 = shalt.err (!%p694_p0)
}
  0x21   :  { %s742_s23 = smov [#allocation11]   ;;  %s698_s3 = scalar_lea.vmem %s63_s21, 16 }
  0x22   :  { %45 = dma.vmem_to_smem %s43_s18, 16, %s742_s23, [#allocation10]  }
  0x23   :  { %p699_p1 = scmp.ne.s32.totalorder %s63_s21, %s698_s3  ;;  %p703_p2 = scmp.lt.s32.totalorder %s63_s21, %s63_s21 }
  0x24   :  { %p704_p3 = scmp.lt.s32.totalorder %s698_s3, %s698_s3 }
  0x26   :  { %p705_p4 = por %p704_p3, %p703_p2 }
  0x28   :  { %p706_p5 = pnand %p705_p4, %p699_p1 }
  0x2a   :  { %709 = shalt.err (!%p706_p5)
}
  0x2b   :  { %s743_s4 = smov [#allocation14]  }
  0x2c   :  { %65 = dma.vmem_to_smem %s63_s21, 16, %s743_s4, [#allocation13]  }
  0x2d   :  { %730 = dma.done.wait [#allocation8], 1024  }
  0x2e   :  { %731 = vsyncadd [#allocation8], 4294966272 }
  0x2f   :  { %732 = dma.done.wait [#allocation10], 16  }
  0x30   :  { %733 = vsyncadd [#allocation10], 4294967280 }
  0x31   :  { %734 = dma.done.wait [#allocation13], 32  }
  0x32   :  { %735 = vsyncadd [#allocation13], 4294967264 }
  0x33   :  { %80 = sfence }
  0x34   :  { %v636_v0 = vld [vmem:[#allocation7 + $0x38] sm:$0xff]   ;;  %v744_v1 = vmov 0.0   ;;  %v745_v2 = vmov 0   ;;  %vm746_vm0 = vmmov 0   ;;  %v111_v3 = vld [vmem:[%s907_s0] sm:$0xff]  ;;  %v639_v10 = vld [vmem:[#allocation7 + $0x20] sm:$0xff]   ;;  %v137_v39 = vstv %s914_s7 }
  0x35   :  { %583 = vmatprep.subr.bf16.mxu0 %v744_v1  ;;  %603 = vmatprep.subr.bf16.mxu1 %v744_v1  ;;  %v637_v4 = vld [vmem:[#allocation7 + $0x30] sm:$0xff]   ;;  %v90_v5 = vld [vmem:[%s909_s2] sm:$0xf]  ;;  %v640_v11 = vld [vmem:[#allocation7 + $0x18] sm:$0xff]   ;;  %s128_s27 = sld [smem:[#allocation11]]  ;;  %vm86_vm2 = vcmask 7168  }
  0x36   :  { %584 = vmatpush3.bf16.xpose.msra.mxu0 %v636_v0  ;;  %634 = vset.pattern.permute.xlu0 %v745_v2  ;;  %v91_v6 = vunpack.c.l.bf16 %v90_v5  ;;  %v638_v7 = vld [vmem:[#allocation7 + $0x28] sm:$0xff]   ;;  %v641_v12 = vld [vmem:[#allocation7 + $0x10] sm:$0xff]   ;;  %v643_v14 = vld [vmem:[#allocation7] sm:$0xff]   ;;  %s131_s28 = sld [smem:[#allocation12]]  ;;  %88 = vst.msk [vmem:[#allocation3] sm:$0xff] %vm86_vm2, %v744_v1 }
  0x37   :  { %585 = vmatprep.subr.bf16.mxu0 %v744_v1  ;;  %599 = vmatprep.mubr.msk.bf16.mxu0 %vm746_vm0, %v744_v1  ;;  %v642_v13 = vld [vmem:[#allocation7 + $0x8] sm:$0xff]   ;;  %s512_s29 = sld [smem:[#allocation11 + $0x1]] }
  0x38   :  { %635 = vset.pattern.permute.xlu1 %v745_v2  ;;  %604 = vmatpush3.bf16.msra.mxu1 %v636_v0  ;;  %v92_v8 = vmul.f32 0.17677669, %v91_v6  ;;  %v510_v16 = vld [vmem:[%s908_s1] ss:$0 sm:$0xff]  ;;  %s513_s30 = sld [smem:[#allocation12 + $0x1]] }
  0x39   :  { %115 = vperm.xlu0 %634, %v111_v3   ;;  %605 = vmatprep.subr.bf16.mxu1 %v744_v1  ;;  %s515_s9 = sld [smem:[#allocation11 + $0x2]] }
  0x3a   :  { %619 = vmatprep.mubr.msk.bf16.mxu1 %vm746_vm0, %v744_v1  ;;  %v93_v9 = vpack.c.bf16 %v92_v8, %v92_v8  ;;  %s127_s10 = sld [smem:[#allocation14]] }
  0x3b   :  { %v129_v20 = vstv %s128_s27  ;;  %s516_s11 = sld [smem:[#allocation12 + $0x2]] }
  0x3c   :  { %606 = vmatpush3.bf16.msra.mxu1 %v637_v4  ;;  %94 = vst [vmem:[#allocation5] sm:$0xf] %v93_v9  ;;  %v132_v22 = vstv %s131_s28  ;;  %s518_s12 = sld [smem:[#allocation11 + $0x3]] }
  0x3d   :  { %607 = vmatprep.subr.bf16.mxu1 %v744_v1  ;;  %v141_v23 = vstv %s512_s29  ;;  %s521_s5 = sld [smem:[#allocation11 + $0x4]] }
  0x3e   :  { %586 = vmatpush3.bf16.xpose.msra.mxu0 %v637_v4  ;;  %s511_s1 = sld [smem:[#allocation14 + $0x1]]  ;;  %v144_v26 = vstv %s513_s30 }
  0x3f   :  { %587 = vmatprep.subr.bf16.mxu0 %v744_v1  ;;  %v152_v27 = vstv %s515_s9  ;;  %s519_s13 = sld [smem:[#allocation12 + $0x3]] }
  0x40   :  { %608 = vmatpush3.bf16.msra.mxu1 %v638_v7  ;;  %s837_s14 = sld [smem:[#allocation11 + $0x5]]  ;;  %v135_v31 = vstv %s127_s10 }
  0x41   :  { %609 = vmatprep.subr.bf16.mxu1 %v744_v1  ;;  %s839_s15 = sld [smem:[#allocation14 + $0x2]]  ;;  %v155_v32 = vstv %s516_s11 }
  0x42   :  { %v163_v33 = vstv %s518_s12  ;;  %s522_s16 = sld [smem:[#allocation12 + $0x4]] }
  0x43   :  { %v310_v15 = vld [vmem:[#allocation5] sm:$0xf]  ;;  %v174_v34 = vstv %s521_s5  ;;  %s842_s17 = sld [smem:[#allocation11 + $0x6]] }
  0x44   :  { %610 = vmatpush3.bf16.msra.mxu1 %v639_v10  ;;  %s844_s18 = sld [smem:[#allocation14 + $0x3]]  ;;  %v147_v40 = vstv %s511_s1 }
  0x45   :  { %611 = vmatprep.subr.bf16.mxu1 %v744_v1  ;;  %v166_v41 = vstv %s519_s13  ;;  %s525_s21 = sld [smem:[#allocation12 + $0x5]] }
  0x46   :  { %588 = vmatpush3.bf16.xpose.msra.mxu0 %v638_v7  ;;  %v185_v43 = vstv %s837_s14  ;;  %s852_s22 = sld [smem:[#allocation11 + $0x7]] }
  0x47   :  { %589 = vmatprep.subr.bf16.mxu0 %v744_v1  ;;  %s520_s23 = sld [smem:[#allocation14 + $0x4]]  ;;  %v158_v48 = vstv %s839_s15 }
  0x48   :  { %612 = vmatpush3.bf16.msra.mxu1 %v640_v11  ;;  %v177_v49 = vstv %s522_s16  ;;  %s528_s3 = sld [smem:[#allocation12 + $0x6]] }
  0x49   :  { %613 = vmatprep.subr.bf16.mxu1 %v744_v1  ;;  %v196_v51 = vstv %s842_s17  ;;  %s857_s7 = sld [smem:[#allocation12 + $0x7]] }
  0x4a   :  { %s523_s4 = sld [smem:[#allocation14 + $0x5]]  ;;  %v169_v56 = vstv %s844_s18 }
  0x4b   :  { %v188_v57 = vstv %s525_s21  ;;  %s533_s6 = sld [smem:[#allocation11 + $0x8]] }
  0x4c   :  { %614 = vmatpush3.bf16.msra.mxu1 %v641_v12  ;;  %s860_s24 = sld [smem:[#allocation14 + $0x6]]  ;;  %v207_v59 = vstv %s852_s22 }
  0x4d   :  { %615 = vmatprep.subr.bf16.mxu1 %v744_v1  ;;  %s864_s25 = sld [smem:[#allocation12 + $0x8]]  ;;  %v180_v0 = vstv %s520_s23  ;;  %s748_s23 = smov [#allocation15]  }
  0x4e   :  { %590 = vmatpush3.bf16.xpose.msra.mxu0 %v639_v10  ;;  %v199_v2 = vstv %s528_s3  ;;  %s536_s26 = sld [smem:[#allocation11 + $0x9]]  ;;  %s499_s3 = sshll.u32 %s748_s23, 4  ;;  %s500_s3 = int_to_ptr.vmem [resolvable:$true] %s499_s3 }
  0x4f   :  { %591 = vmatprep.subr.bf16.mxu0 %v744_v1  ;;  %s866_s0 = sld [smem:[#allocation14 + $0x7]]  ;;  %v210_v4 = vstv %s857_s7  ;;  %s710_s7 = scalar_lea.vmem %s500_s3, 128 }
  0x50   :  { %616 = vmatpush3.bf16.msra.mxu1 %v642_v13  ;;  %s870_s2 = sld [smem:[#allocation12 + $0x9]]  ;;  %v191_v9 = vstv %s523_s4  ;;  %p711_p6 = scmp.ne.s32.totalorder %s500_s3, %s710_s7 }
  0x51   :  { %617 = vmatprep.subr.bf16.mxu1 %v744_v1  ;;  %v218_v10 = vstv %s533_s6  ;;  %s539_s27 = sld [smem:[#allocation11 + $0xa]]  ;;  %p715_p7 = scmp.lt.s32.totalorder %s500_s3, %s500_s3 }
  0x52   :  { %s872_s28 = sld [smem:[#allocation11 + $0xb]]  ;;  %p716_p8 = scmp.lt.s32.totalorder %s710_s7, %s710_s7 }
  0x53   :  { %s874_s29 = sld [smem:[#allocation14 + $0x8]] }
  0x54   :  { %618 = vmatpush3.bf16.msra.mxu1 %v643_v14  ;;  %s540_s30 = sld [smem:[#allocation12 + $0xa]]  ;;  %p717_p9 = por %p716_p8, %p715_p7 }
  0x55   :  { %s880_s9 = sld [smem:[#allocation11 + $0xc]] }
  0x56   :  { %592 = vmatpush3.bf16.xpose.msra.mxu0 %v640_v11  ;;  %s882_s10 = sld [smem:[#allocation14 + $0x9]]  ;;  %p718_p10 = pnand %p717_p9, %p711_p6 }
  0x57   :  { %593 = vmatprep.subr.bf16.mxu0 %v744_v1  ;;  %s543_s11 = sld [smem:[#allocation12 + $0xb]] }
  0x58   :  { %s887_s12 = sld [smem:[#allocation11 + $0xd]] }
  0x59   :  { %s538_s5 = sld [smem:[#allocation14 + $0xa]] }
  0x5a   :  { %s546_s1 = sld [smem:[#allocation12 + $0xc]] }
  0x5b   :  { %s551_s13 = sld [smem:[#allocation11 + $0xe]] }
  0x5c   :  { %s541_s14 = sld [smem:[#allocation14 + $0xb]] }
  0x5d   :  { %s549_s15 = sld [smem:[#allocation12 + $0xd]] }
  0x5e   :  { %594 = vmatpush3.bf16.xpose.msra.mxu0 %v641_v12  ;;  %s552_s16 = sld [smem:[#allocation12 + $0xe]] }
  0x5f   :  { %595 = vmatprep.subr.bf16.mxu0 %v744_v1  ;;  %s544_s17 = sld [smem:[#allocation14 + $0xc]] }
  0x60   :  { %s554_s18 = sld [smem:[#allocation11 + $0xf]] }
  0x61   :  { %s547_s19 = sld [smem:[#allocation14 + $0xd]] }
  0x62   :  { %s555_s20 = sld [smem:[#allocation12 + $0xf]] }
  0x63   :  { %s550_s21 = sld [smem:[#allocation14 + $0xe]] }
  0x64   :  { %s553_s22 = sld [smem:[#allocation14 + $0xf]] }
  0x66   :  { %596 = vmatpush3.bf16.xpose.msra.mxu0 %v642_v13 }
  0x67   :  { %597 = vmatprep.subr.bf16.mxu0 %v744_v1  ;;  %v422_v1 = vld [vmem:[#allocation3] sm:$0xff] }
  0x6e   :  { %598 = vmatpush3.bf16.xpose.msra.mxu0 %v643_v14 }
  0x75   :  { %600 = vmatmul.mubr.bf16.vlgmr.msra.gmra.mxu0 %v310_v15 }
  0xb4   :  { %v116_v17 = vpop.permute.xlu0 %115 }
  0xb5   :  { %v124_v18 = vsub.f32 %v116_v17, %v510_v16  ;;  %v202_v16 = vstv %s860_s24  ;;  %v221_v17 = vstv %s864_s25 }
  0xb7   :  { %v833_v19 = vand.u32 2147483647, %v124_v18  ;;  %v229_v18 = vstv %s536_s26 }
  0xb9   :  { %v130_v21 = vmul.f32 %v129_v20, %v833_v19  ;;  %v142_v25 = vmul.f32 %v141_v23, %v833_v19  ;;  %v153_v30 = vmul.f32 %v152_v27, %v833_v19  ;;  %v164_v38 = vmul.f32 %v163_v33, %v833_v19 }
  0xba   :  { %v175_v42 = vmul.f32 %v174_v34, %v833_v19  ;;  %v186_v50 = vmul.f32 %v185_v43, %v833_v19  ;;  %v197_v58 = vmul.f32 %v196_v51, %v833_v19  ;;  %v208_v3 = vmul.f32 %v207_v59, %v833_v19 }
  0xbb   :  { %v133_v24 = vadd.f32 %v132_v22, %v130_v21  ;;  %v145_v29 = vadd.f32 %v144_v26, %v142_v25  ;;  %v156_v37 = vadd.f32 %v155_v32, %v153_v30  ;;  %v167_v47 = vadd.f32 %v166_v41, %v164_v38 }
  0xbc   :  { %v178_v55 = vadd.f32 %v177_v49, %v175_v42  ;;  %v189_v63 = vadd.f32 %v188_v57, %v186_v50  ;;  %v200_v8 = vadd.f32 %v199_v2, %v197_v58  ;;  %v211_v11 = vadd.f32 %v210_v4, %v208_v3 }
  0xbd   :  { %v134_v28 = vmax.f32 %v133_v24, 0.0  ;;  %v146_v36 = vmax.f32 %v145_v29, 0.0  ;;  %v157_v46 = vmax.f32 %v156_v37, 0.0  ;;  %v168_v54 = vmax.f32 %v167_v47, 0.0 }
  0xbe   :  { %v179_v62 = vmax.f32 %v178_v55, 0.0  ;;  %v190_v7 = vmax.f32 %v189_v63, 0.0  ;;  %v201_v14 = vmax.f32 %v200_v8, 0.0  ;;  %v219_v15 = vmul.f32 %v218_v10, %v833_v19 }
  0xbf   :  { %v136_v35 = vmul.f32 %v135_v31, %v134_v28  ;;  %v148_v45 = vmul.f32 %v147_v40, %v146_v36  ;;  %v159_v53 = vmul.f32 %v158_v48, %v157_v46  ;;  %v170_v61 = vmul.f32 %v169_v56, %v168_v54 }
  0xc0   :  { %v181_v6 = vmul.f32 %v180_v0, %v179_v62  ;;  %v192_v13 = vmul.f32 %v191_v9, %v190_v7  ;;  %v212_v20 = vmax.f32 %v211_v11, 0.0  ;;  %v213_v21 = vstv %s866_s0 }
  0xc1   :  { %v138_v44 = vadd.f32 %v137_v39, %v136_v35  ;;  %v203_v23 = vmul.f32 %v202_v16, %v201_v14  ;;  %v222_v24 = vadd.f32 %v221_v17, %v219_v15  ;;  %v230_v25 = vmul.f32 %v229_v18, %v833_v19 }
  0xc2   :  { %v232_v26 = vstv %s870_s2  ;;  %v240_v27 = vstv %s539_s27  ;;  %v214_v28 = vmul.f32 %v213_v21, %v212_v20  ;;  %v251_v29 = vstv %s872_s28 }
  0xc3   :  { %v149_v52 = vadd.f32 %v148_v45, %v138_v44  ;;  %v223_v31 = vmax.f32 %v222_v24, 0.0  ;;  %v233_v32 = vadd.f32 %v232_v26, %v230_v25  ;;  %v241_v33 = vmul.f32 %v240_v27, %v833_v19 }
  0xc4   :  { %v224_v34 = vstv %s874_s29  ;;  %v243_v35 = vstv %s540_s30  ;;  %v252_v36 = vmul.f32 %v251_v29, %v833_v19  ;;  %v262_v37 = vstv %s880_s9 }
  0xc5   :  { %v160_v60 = vadd.f32 %v159_v53, %v149_v52  ;;  %v225_v39 = vmul.f32 %v224_v34, %v223_v31  ;;  %v234_v40 = vmax.f32 %v233_v32, 0.0  ;;  %v244_v41 = vadd.f32 %v243_v35, %v241_v33 }
  0xc6   :  { %v235_v42 = vstv %s882_s10  ;;  %v254_v43 = vstv %s543_s11  ;;  %v263_v44 = vmul.f32 %v262_v37, %v833_v19  ;;  %v273_v45 = vstv %s887_s12 }
  0xc7   :  { %v171_v5 = vadd.f32 %v170_v61, %v160_v60  ;;  %v236_v47 = vmul.f32 %v235_v42, %v234_v40  ;;  %v245_v48 = vmax.f32 %v244_v41, 0.0  ;;  %v255_v49 = vadd.f32 %v254_v43, %v252_v36 }
  0xc8   :  { %v246_v50 = vstv %s538_s5  ;;  %v265_v51 = vstv %s546_s1  ;;  %v274_v52 = vmul.f32 %v273_v45, %v833_v19  ;;  %v284_v53 = vstv %s551_s13 }
  0xc9   :  { %v182_v12 = vadd.f32 %v181_v6, %v171_v5  ;;  %v247_v55 = vmul.f32 %v246_v50, %v245_v48  ;;  %v256_v56 = vmax.f32 %v255_v49, 0.0  ;;  %v266_v57 = vadd.f32 %v265_v51, %v263_v44 }
  0xca   :  { %v257_v58 = vstv %s541_s14  ;;  %v276_v59 = vstv %s549_s15  ;;  %v285_v60 = vmul.f32 %v284_v53, %v833_v19  ;;  %v287_v61 = vstv %s552_s16 }
  0xcb   :  { %v193_v22 = vadd.f32 %v192_v13, %v182_v12  ;;  %v258_v63 = vmul.f32 %v257_v58, %v256_v56  ;;  %v267_v0 = vmax.f32 %v266_v57, 0.0  ;;  %v277_v2 = vadd.f32 %v276_v59, %v274_v52 }
  0xcc   :  { %v268_v3 = vstv %s544_s17  ;;  %v295_v4 = vstv %s554_s18  ;;  %v288_v5 = vadd.f32 %v287_v61, %v285_v60  ;;  %v279_v10 = vstv %s547_s19 }
  0xcd   :  { %v204_v30 = vadd.f32 %v203_v23, %v193_v22  ;;  %v269_v7 = vmul.f32 %v268_v3, %v267_v0  ;;  %v278_v8 = vmax.f32 %v277_v2, 0.0  ;;  %v296_v9 = vmul.f32 %v295_v4, %v833_v19 }
  0xce   :  { %v298_v11 = vstv %s555_s20  ;;  %v289_v14 = vmax.f32 %v288_v5, 0.0  ;;  %v290_v16 = vstv %s550_s21  ;;  %v301_v21 = vstv %s553_s22 }
  0xcf   :  { %v215_v38 = vadd.f32 %v214_v28, %v204_v30  ;;  %v280_v13 = vmul.f32 %v279_v10, %v278_v8  ;;  %v299_v15 = vadd.f32 %v298_v11, %v296_v9  ;;  %v401_v19 = vlaneseq }
  0xd0   :  { %v291_v18 = vmul.f32 %v290_v16, %v289_v14  ;;  %v747_v36 = vmov -inf  }
  0xd1   :  { %v226_v46 = vadd.f32 %v225_v39, %v215_v38  ;;  %v300_v20 = vmax.f32 %v299_v15, 0.0  ;;  %v402_v28 = vand.u32 127, %v401_v19  ;;  %87 = vst.msk [vmem:[#allocation2] sm:$0xff] %vm86_vm2, %v747_v36 }
  0xd3   :  { %v237_v54 = vadd.f32 %v236_v47, %v226_v46  ;;  %v302_v23 = vmul.f32 %v301_v21, %v300_v20  ;;  %vm405_vm1 = vcmp.lt.s32.totalorder %v402_v28, 8 }
  0xd5   :  { %v248_v62 = vadd.f32 %v247_v55, %v237_v54 }
  0xd7   :  { %v259_v6 = vadd.f32 %v258_v63, %v248_v62 }
  0xd8   :  { %v407_v37 = vld [vmem:[#allocation2] sm:$0xff] }
  0xd9   :  { %v270_v12 = vadd.f32 %v269_v7, %v259_v6 }
  0xdb   :  { %v281_v17 = vadd.f32 %v280_v13, %v270_v12 }
  0xdd   :  { %v292_v22 = vadd.f32 %v291_v18, %v281_v17 }
  0xdf   :  { %v303_v24 = vadd.f32 %v302_v23, %v292_v22 }
  0xe1   :  { %v556_v25 = vmul.f32 -1.442695, %v303_v24 }
  0xe3   :  { %644 = vpow2.f32 %v556_v25 }
  0xf0   :  { %v645_v26 = vpop.eup %644 }
  0xf1   :  { %v307_v27 = vadd.f32 1.0, %v645_v26 }
  0xf3   :  { %646 = vrcp.f32 %v307_v27 }
 0x100   :  { %v647_v29 = vpop.eup %646 }
 0x135   :  { %v393_v30 = vpop.f32.mrf.mxu0 }
 0x136   :  { %v399_v31 = vmul.f32 %v647_v29, %v393_v30 }
 0x137   :  { %v601_v32 = vpop.f32.mrf.mxu0 }
 0x138   :  { %v406_v33 = vsel %vm405_vm1, %v399_v31, -inf }
 0x139   :  { %408 = vmax.xlane.f32.xlu0 %v406_v33  ;;  %v396_v34 = vpop.f32.mrf.mxu0 }
 0x13b   :  { %v602_v35 = vpop.f32.mrf.mxu0 }
 0x1c2   :  { %v409_v38 = vpop.xlane.xlu0 %408 }
 0x1c3   :  { %v410_v39 = vmax.f32 %v407_v37, %v409_v38 }
 0x1c5   :  { %v411_v40 = vsub.f32 %v407_v37, %v410_v39  ;;  %479 = vst.msk [vmem:[#allocation2] sm:$0xff] %vm86_vm2, %v410_v39  ;;  %416 = vperm.xlu1 %635, %v410_v39  }
 0x1c7   :  { %v412_v41 = vmul.f32 1.442695, %v411_v40 }
 0x1c9   :  { %648 = vpow2.f32 %v412_v41 }
 0x1d6   :  { %v649_v42 = vpop.eup %648 }
 0x1d7   :  { %432 = vperm.xlu0 %634, %v649_v42   ;;  %v423_v48 = vmul.f32 %v649_v42, %v422_v1 }
 0x240   :  { %v417_v43 = vpop.permute.xlu1 %416 }
 0x241   :  { %v419_v44 = vsub.f32 %v406_v33, %v417_v43 }
 0x243   :  { %v420_v45 = vmul.f32 1.442695, %v419_v44 }
 0x245   :  { %650 = vpow2.f32 %v420_v45 }
 0x252   :  { %v651_v46 = vpop.eup %650  ;;  %v433_v57 = vpop.permute.xlu0 %432 }
 0x253   :  { %424 = vadd.xlane.f32.xlu1 %v651_v46  ;;  %v436_v47 = vpack.c.bf16 %v651_v46, %v651_v46  ;;  %v435_v58 = vmul.f32 0.0, %v433_v57 }
 0x255   :  { %620 = vmatmul.mubr.bf16.vlgmr.msra.gmra.mxu1 %v436_v47 }
 0x2dc   :  { %v425_v49 = vpop.xlane.xlu1 %424 }
 0x2dd   :  { %v426_v50 = vadd.f32 %v425_v49, %v423_v48 }
 0x2df   :  { %428 = vst.msk [vmem:[#allocation3] sm:$0xff] %vm86_vm2, %v426_v50 }
 0x2e6   :  { %v484_v51 = vld [vmem:[#allocation3] sm:$0xff] }
 0x2e7   :  { %652 = vrcp.f32 %v484_v51 }
 0x2f4   :  { %v653_v52 = vpop.eup %652 }
 0x2f5   :  { %488 = vperm.xlu1 %635, %v653_v52  }
 0x315   :  { %v471_v53 = vpop.f32.mrf.mxu1 }
 0x316   :  { %v477_v59 = vadd.f32 %v471_v53, %v435_v58 }
 0x317   :  { %v621_v54 = vpop.f32.mrf.mxu1 }
 0x319   :  { %v474_v55 = vpop.f32.mrf.mxu1 }
 0x31b   :  { %v622_v56 = vpop.f32.mrf.mxu1 }
 0x370   :  { %v489_v60 = vpop.permute.xlu1 %488 }
 0x371   :  { %v491_v61 = vmul.f32 %v489_v60, %v477_v59 }
 0x373   :  { %492 = vst [vmem:[#allocation15] sm:$0xff] %v491_v61 }
 0x374   :  { %721 = shalt.err (!%p718_p10)
}
 0x375   :  { %502 = dma.vmem_to_hbm [thread:$0]  %s500_s3, 128, %s915_s8, [#allocation9]  }
 0x376   :  { %736 = dma.done.wait [#allocation9], 128  }
 0x377   :  { %737 = vsyncadd [#allocation9], 4294967168 }
 0x378   :  { %506 = vsyncpa [#allocation8], 1 }
 0x379   :  { %507 = vsyncpa [#allocation9], 1 }
 0x37a   :  { %508 = vsyncpa [#allocation10], 1 }
 0x37b   :  { %509 = vsyncpa [#allocation13], 1 }

</bundles_post_ra>
